<compile_context>
chip_gen: v7x
topology: tpu7x:2x2x1
jax: 0.10.0
libtpu: 0.0.40
codegen_flags: <defaults>
</compile_context>

<pallas_src>
import jax
import jax.numpy as jnp
from jax.experimental import pallas as pl
from jax.experimental.pallas import tpu as pltpu

n_embd = 384          # from the module
context_length = 256  # upper bound on T


def _head_kernel(x_ref, w_ref, o_ref):
    # x_ref: (1, T, C) bf16   one batch element
    # w_ref: (C, 3H)   bf16   fused [Wq | Wk | Wv] (same block for every grid step -> resident)
    # o_ref: (1, T, H) f32    output for this batch element
    T = x_ref.shape[1]
    C = x_ref.shape[2]
    H = o_ref.shape[2]

    # Fused QKV projection: a single MXU matmul with N = 3H (better column occupancy than
    # three N=64 matmuls). f32 accumulation.
    qkv = jnp.dot(x_ref[0], w_ref[...], preferred_element_type=jnp.float32)     # (T, 3H) f32

    # Module scales by C**-0.5 (n_embd), NOT head_size; fold it into q once, in f32.
    scale = C ** (-0.5)
    q = (qkv[:, :H] * scale).astype(jnp.bfloat16)                               # (T, H)
    k = qkv[:, H:2 * H].astype(jnp.bfloat16)                                    # (T, H)
    v = qkv[:, 2 * H:].astype(jnp.bfloat16)                                     # (T, H)

    # Block-causal q-tile loop (static unroll: nq <= 2 for context_length = 256).
    tq = 128 if (T % 128 == 0) else T
    nq = T // tq
    for qi in range(nq):
        r0 = qi * tq
        kv_len = r0 + tq            # keys beyond this are fully masked for this q-tile -> skipped
        q_blk = q[r0:r0 + tq, :]    # (tq, H)
        k_blk = k[:kv_len, :]       # (kv_len, H)
        v_blk = v[:kv_len, :]       # (kv_len, H)

        # scores = q_blk @ k_blk^T — NT contraction, no explicit transpose of k.
        s = jax.lax.dot_general(
            q_blk, k_blk,
            dimension_numbers=(((1,), (1,)), ((), ())),
            preferred_element_type=jnp.float32)                                 # (tq, kv_len)

        # Causal mask: keep columns <= global row index. Built from a (tq,1) and a (1,kv) iota
        # with a broadcasting compare (no full-size iota materialization / add).
        rows = r0 + jax.lax.broadcasted_iota(jnp.int32, (tq, 1), 0)
        cols = jax.lax.broadcasted_iota(jnp.int32, (1, kv_len), 1)
        s = jnp.where(cols <= rows, s, -1e30)   # finite large-negative: NaN-safe

        # Numerically stable softmax in f32; normalization deferred past the PV matmul.
        m = jnp.max(s, axis=-1, keepdims=True)
        p = jnp.exp(s - m)
        denom = jnp.sum(p, axis=-1, keepdims=True)                              # (tq, 1)

        o_t = jnp.dot(p.astype(jnp.bfloat16), v_blk,
                      preferred_element_type=jnp.float32)                       # (tq, H)
        o_t = o_t * pl.reciprocal(denom, approx=True)   # (tq, H) normalize: ~4x fewer muls than on p

        o_ref[0, r0:r0 + tq, :] = o_t.astype(o_ref.dtype)


def fuse_head_weights(wq, wk, wv):
    """Precompute the fused bf16 (C, 3H) projection weight — hoisted out of the forward path."""
    return jnp.concatenate([wq, wk, wv], axis=1).astype(jnp.bfloat16)


def head_forward(x, w_qkv):
    """x: (B, T, C) float32; w_qkv: (C, 3H) bf16 (from fuse_head_weights) -> (B, T, H) float32."""
    B, T, C = x.shape
    H = w_qkv.shape[1] // 3

    x_bf = x.astype(jnp.bfloat16)   # halve x HBM->VMEM traffic; matmuls are bf16 anyway

    return pl.pallas_call(
        _head_kernel,
        out_shape=jax.ShapeDtypeStruct((B, T, H), x.dtype),
        grid_spec=pltpu.PrefetchScalarGridSpec(
            num_scalar_prefetch=0,
            grid=(B,),
            in_specs=[
                pl.BlockSpec((1, T, C), lambda b: (b, 0, 0)),
                pl.BlockSpec((C, 3 * H), lambda b: (0, 0)),   # constant block -> stays resident
            ],
            out_specs=pl.BlockSpec((1, T, H), lambda b: (b, 0, 0)),
        ),
        compiler_params=pltpu.CompilerParams(
            dimension_semantics=("parallel",),   # batch elements are independent (megacore)
        ),
    )(x_bf, w_qkv)


def head_reference(x, wq, wk, wv):
    """Plain-JAX f32 reference mirroring the PyTorch forward (eval mode)."""
    B, T, C = x.shape
    q = x @ wq
    k = x @ wk
    v = x @ wv
    wei = (q @ jnp.swapaxes(k, -2, -1)) * C ** (-0.5)
    tril = jnp.tril(jnp.ones((T, T), dtype=bool))
    wei = jnp.where(tril, wei, -jnp.inf)
    wei = jax.nn.softmax(wei, axis=-1)
    return wei @ v


if __name__ == "__main__":
    key = jax.random.PRNGKey(0)
    k_x, k_q, k_k, k_v = jax.random.split(key, 4)

    B, T = 2, 8
    C = n_embd        # 384
    head_size = 64

    x = jax.random.normal(k_x, (B, T, C), dtype=jnp.float32)
    # deterministic "Linear(bias=False)"-style init, stored as (C, head_size)
    bound = 1.0 / (C ** 0.5)
    wq = jax.random.uniform(k_q, (C, head_size), jnp.float32, -bound, bound)
    wk = jax.random.uniform(k_k, (C, head_size), jnp.float32, -bound, bound)
    wv = jax.random.uniform(k_v, (C, head_size), jnp.float32, -bound, bound)

    # Fused bf16 weight is built ONCE, outside the forward path.
    w_qkv = fuse_head_weights(wq, wk, wv)

    out = head_forward(x, w_qkv)
    out = jax.block_until_ready(out)

    ref = head_reference(x, wq, wk, wv)
    assert out.shape == (B, T, head_size)
    # bf16 MXU inputs + approx reciprocal -> compare against the f32 reference with a
    # bf16-appropriate tolerance.
    assert jnp.allclose(out, ref, atol=3e-2, rtol=3e-2), float(jnp.max(jnp.abs(out - ref)))

    print("KERNEL_OK")
</pallas_src>

<mosaic_0001>
module attributes {stable_mosaic.version = 11 : i64} {
  func.func @_head_kernel(%arg0: i32, %arg1: memref<1x8x384xbf16, #tpu.memory_space<vmem>>, %arg2: memref<384x192xbf16, #tpu.memory_space<vmem>>, %arg3: memref<1x8x64xf32, #tpu.memory_space<vmem>>) attributes {dimension_semantics = [#tpu.dimension_semantics<parallel>], iteration_bounds = array<i64: 2>, scalar_prefetch = 0 : i64, scratch_operands = 0 : i64, tpu.core_type = #tpu.core_type<tc>, window_params = [{transform_indices = @transform_0, window_bounds = array<i64: 1, 8, 384>}, {pipeline_mode = #tpu.pipeline_mode<synchronous>, transform_indices = @transform_1, window_bounds = array<i64: 384, 192>}, {transform_indices = @transform_2, window_bounds = array<i64: 1, 8, 64>}]} {
    %c0 = arith.constant 0 : index
    %c0_0 = arith.constant 0 : index
    %c0_1 = arith.constant 0 : index
    %0 = vector.load %arg1[%c0, %c0_0, %c0_1] : memref<1x8x384xbf16, #tpu.memory_space<vmem>>, vector<1x8x384xbf16>
    %1 = vector.shape_cast %0 : vector<1x8x384xbf16> to vector<8x384xbf16>
    %c0_2 = arith.constant 0 : index
    %c0_3 = arith.constant 0 : index
    %2 = vector.load %arg2[%c0_2, %c0_3] : memref<384x192xbf16, #tpu.memory_space<vmem>>, vector<384x192xbf16>
    %cst = arith.constant dense<0.000000e+00> : vector<8x192xf32>
    %3 = tpu.matmul %1, %2, %cst {dimension_numbers = #tpu.dot_dimension_numbers<[1], [0], [0], [1], [0, 0, 1, 1], [], []>} : vector<8x384xbf16>, vector<384x192xbf16>, vector<8x192xf32> -> vector<8x192xf32>
    %4 = vector.extract_strided_slice %3 {offsets = [0, 0], sizes = [8, 64], strides = [1, 1]} : vector<8x192xf32> to vector<8x64xf32>
    %cst_4 = arith.constant 0.0510310382 : f32
    %5 = vector.broadcast %cst_4 : f32 to vector<8x64xf32>
    %6 = arith.mulf %4, %5 : vector<8x64xf32>
    %7 = arith.truncf %6 : vector<8x64xf32> to vector<8x64xbf16>
    %8 = vector.extract_strided_slice %3 {offsets = [0, 64], sizes = [8, 64], strides = [1, 1]} : vector<8x192xf32> to vector<8x64xf32>
    %9 = arith.truncf %8 : vector<8x64xf32> to vector<8x64xbf16>
    %10 = vector.extract_strided_slice %3 {offsets = [0, 128], sizes = [8, 64], strides = [1, 1]} : vector<8x192xf32> to vector<8x64xf32>
    %11 = arith.truncf %10 : vector<8x64xf32> to vector<8x64xbf16>
    %cst_5 = arith.constant dense<0.000000e+00> : vector<8x8xf32>
    %12 = tpu.matmul %7, %9, %cst_5 {dimension_numbers = #tpu.dot_dimension_numbers<[1], [1], [0], [0], [0, 0, 1, 0], [], []>} : vector<8x64xbf16>, vector<8x64xbf16>, vector<8x8xf32> -> vector<8x8xf32>
    %13 = tpu.iota {dimensions = array<i32: 0>} : vector<8x1xi32>
    %c0_i32 = arith.constant 0 : i32
    %14 = vector.broadcast %c0_i32 : i32 to vector<8x1xi32>
    %15 = arith.addi %14, %13 : vector<8x1xi32>
    %16 = tpu.iota {dimensions = array<i32: 1>} : vector<1x8xi32>
    %17 = vector.broadcast %16 : vector<1x8xi32> to vector<8x8xi32>
    %18 = vector.broadcast %15 : vector<8x1xi32> to vector<8x8xi32>
    %19 = arith.cmpi sle, %17, %18 : vector<8x8xi32>
    %cst_6 = arith.constant -1.000000e+30 : f32
    %20 = vector.broadcast %cst_6 : f32 to vector<8x8xf32>
    %21 = arith.select %19, %12, %20 : vector<8x8xi1>, vector<8x8xf32>
    %cst_7 = arith.constant dense<0xFF800000> : vector<8xf32>
    %22 = vector.multi_reduction <maximumf>, %21, %cst_7 [1] : vector<8x8xf32> to vector<8xf32>
    %23 = vector.shape_cast %22 : vector<8xf32> to vector<8x1xf32>
    %24 = vector.broadcast %23 : vector<8x1xf32> to vector<8x8xf32>
    %25 = arith.subf %21, %24 : vector<8x8xf32>
    %26 = math.exp %25 : vector<8x8xf32>
    %cst_8 = arith.constant dense<0.000000e+00> : vector<8xf32>
    %27 = vector.multi_reduction <add>, %26, %cst_8 [1] : vector<8x8xf32> to vector<8xf32>
    %28 = vector.shape_cast %27 : vector<8xf32> to vector<8x1xf32>
    %29 = arith.truncf %26 : vector<8x8xf32> to vector<8x8xbf16>
    %cst_9 = arith.constant dense<0.000000e+00> : vector<8x64xf32>
    %30 = tpu.matmul %29, %11, %cst_9 {dimension_numbers = #tpu.dot_dimension_numbers<[1], [0], [0], [1], [0, 0, 1, 1], [], []>} : vector<8x8xbf16>, vector<8x64xbf16>, vector<8x64xf32> -> vector<8x64xf32>
    %31 = tpu.reciprocal %28 {approx = true} : vector<8x1xf32> -> vector<8x1xf32>
    %32 = vector.broadcast %31 : vector<8x1xf32> to vector<8x64xf32>
    %33 = arith.mulf %30, %32 : vector<8x64xf32>
    %c0_10 = arith.constant 0 : index
    %c0_11 = arith.constant 0 : index
    %c0_12 = arith.constant 0 : index
    %34 = vector.load %arg3[%c0_10, %c0_11, %c0_12] : memref<1x8x64xf32, #tpu.memory_space<vmem>>, vector<1x8x64xf32>
    %35 = vector.shape_cast %34 : vector<1x8x64xf32> to vector<8x64xf32>
    %36 = vector.shape_cast %33 : vector<8x64xf32> to vector<1x8x64xf32>
    tpu.vector_store %arg3[%c0_10, %c0_11, %c0_12], %36 {strides = array<i32>} : memref<1x8x64xf32, #tpu.memory_space<vmem>>, vector<1x8x64xf32>,
    return
  }
  func.func @transform_0(%arg0: i32) -> (i32, i32, i32) {
    %c0_i32 = arith.constant 0 : i32
    %c0_i32_0 = arith.constant 0 : i32
    %c0_i32_1 = arith.constant 0 : i32
    return %arg0, %c0_i32, %c0_i32_0 : i32, i32, i32
  }
  func.func @transform_1(%arg0: i32) -> (i32, i32) {
    %c0_i32 = arith.constant 0 : i32
    %c0_i32_0 = arith.constant 0 : i32
    %c0_i32_1 = arith.constant 0 : i32
    return %c0_i32, %c0_i32_0 : i32, i32
  }
  func.func @transform_2(%arg0: i32) -> (i32, i32, i32) {
    %c0_i32 = arith.constant 0 : i32
    %c0_i32_0 = arith.constant 0 : i32
    %c0_i32_1 = arith.constant 0 : i32
    return %arg0, %c0_i32, %c0_i32_0 : i32, i32, i32
  }
}

</mosaic_0001>

<bundles_post_ra>
// kernel: tpu_custom_call.1
= control target key start
LH: loop header
LB: loop body
LE: loop exit
PB: predicated region body
PF: predicated region fallthrough
CT: control target
= control target key end

     0   :  { %7 = vsyncpa [#allocation3], 0  ;;  %s1260_s0 = inlined_call_operand.vmem [shape: bf16[2,8,384], index: 0, kind: input, shape index: {}]   ;;  %s1261_s1 = inlined_call_operand.vmem [shape: bf16[384,192], index: 1, kind: input, shape index: {}]   ;;  %s1262_s2 = inlined_call_operand.hbm [shape: f32[2,8,64], index: 2, kind: output, shape index: {}]  }
   0x1   :  { %9 = vsyncpa [#allocation3 + $0x1], 0  ;;  %s1008_s9 = smov 0   ;;  %s1010_s10 = smov 0  }
   0x2   :  { %s1012_s11 = smov 0   ;;  %s1014_s12 = smov 0  }
   0x3 LB: > { %s1029_s13 = sadd.s32 4294967295, %s986_s12   ;;  %s720_s14 = sadd.s32 4294967294, %s986_s12   ;;  %s986_s12 = sphi %s1014_s12, %s1268_s12   ;;  %s982_s11 = sphi %s1012_s11, %s1267_s11   ;;  %s978_s10 = sphi %s1010_s10, %s1266_s10   ;;  %s974_s9 = sphi %s1008_s9, %s1265_s9  }
   0x4   : > { %s1033_s15 = sadd.s32 1, %s986_s12   ;;  %s69_s16 = sadd.s32 1, %s982_s11 }
   0x5   : > { %s66_s17 = ssub.s32 %s986_s12, %s1033_s15  ;;  %p79_p0 = scmp.ne.s32.totalorder %s982_s11, %s978_s10 }
   0x6   : > { %p67_p1 = scmp.eq.s32.totalorder %s66_s17, 0  ;;  %p80_p2 = scmp.eq.s32.totalorder %s1029_s13, 1 }
   0x7   : > { %p85_p3 = scmp.ne.s32.totalorder %s978_s10, %s974_s9  ;;  %p86_p4 = scmp.eq.s32.totalorder %s720_s14, 1 }
   0x8   : > { %s1044_s18 = scalar_select %p67_p1, %s982_s11, %s69_s16  }
   0x9   : > { %p1046_p5 = por %p80_p2, %p79_p0  ;;  %p1050_p6 = por %p86_p4, %p85_p3 }
   0xa   : > { %p723_p7 = scmp.ge.s32.totalorder %s986_s12, 1  ;;  %p115_p8 = scmp.lt.s32.totalorder %s986_s12, 3 }
   0xc   : > { %p116_p9 = pnand %p723_p7, %p115_p8 }
   0xd   : > { %v845_v0 = vld [vmem:[%s1261_s1 + $0x4] ss:$8 sps:$4 sm:$0xff] (!%p116_p9)   ;;  %v847_v1 = vld [vmem:[%s1261_s1] ss:$8 sps:$4 sm:$0xff] (!%p116_p9)   ;;  %v988_v2 = vmov (!%p116_p9), 0   ;;  %p137_p10 = scmp.lt.s32.totalorder (!%p116_p9), %s1029_s13, 1 }
   0xe   : > { %119 = sbr.rel (%p116_p9) target bundleno = 1018 (0x3fa), region = 28  ;;  %517 = vmatprep.mubr.bf16.mxu1 (!%p116_p9), %v988_v2  ;;  %444 = vmatprep.subr.bf16.mxu0 (!%p116_p9), %v845_v0  ;;  %v848_v3 = vld [vmem:[%s1261_s1 + $0x14] ss:$8 sps:$4 sm:$0xff] (!%p116_p9)   ;;  %v850_v4 = vld [vmem:[%s1261_s1 + $0x10] ss:$8 sps:$4 sm:$0xff] (!%p116_p9)   ;;  %v989_v57 = vmov (!%p116_p9), 0.0  }
   0xf   : > { %445 = vmatpush1.bf16.msra.mxu0 (!%p116_p9), %v847_v1  ;;  %v851_v5 = vld [vmem:[%s1261_s1 + $0x24] ss:$8 sps:$4 sm:$0xff] (!%p116_p9)   ;;  %v853_v6 = vld [vmem:[%s1261_s1 + $0x20] ss:$8 sps:$4 sm:$0xff] (!%p116_p9)   ;;  %v854_v7 = vld [vmem:[%s1261_s1 + $0x34] ss:$8 sps:$4 sm:$0xff] (!%p116_p9)  }
  0x10   : > { %446 = vmatprep.subr.bf16.mxu0 (!%p116_p9), %v848_v3  ;;  %v856_v8 = vld [vmem:[%s1261_s1 + $0x30] ss:$8 sps:$4 sm:$0xff] (!%p116_p9)   ;;  %v869_v9 = vld [vmem:[%s1261_s1 + $0x104] ss:$8 sps:$4 sm:$0xff] (!%p116_p9)   ;;  %v871_v10 = vld [vmem:[%s1261_s1 + $0x100] ss:$8 sps:$4 sm:$0xff] (!%p116_p9)  }
  0x11   : > { %v857_v11 = vld [vmem:[%s1261_s1 + $0x44] ss:$8 sps:$4 sm:$0xff] (!%p116_p9)   ;;  %485 = vmatprep.subr.bf16.mxu1 (!%p116_p9), %v869_v9  ;;  %v875_v12 = vld [vmem:[%s1261_s1 + $0x114] ss:$8 sps:$4 sm:$0xff] (!%p116_p9)   ;;  %v877_v13 = vld [vmem:[%s1261_s1 + $0x110] ss:$8 sps:$4 sm:$0xff] (!%p116_p9)  }
  0x12   : > { %486 = vmatpush1.bf16.msra.mxu1 (!%p116_p9), %v871_v10  ;;  %v859_v14 = vld [vmem:[%s1261_s1 + $0x40] ss:$8 sps:$4 sm:$0xff] (!%p116_p9)   ;;  %v860_v15 = vld [vmem:[%s1261_s1 + $0x54] ss:$8 sps:$4 sm:$0xff] (!%p116_p9)   ;;  %v881_v16 = vld [vmem:[%s1261_s1 + $0x124] ss:$8 sps:$4 sm:$0xff] (!%p116_p9)  }
  0x13   : > { %447 = vmatpush1.bf16.msra.mxu0 (!%p116_p9), %v850_v4  ;;  %487 = vmatprep.subr.bf16.mxu1 (!%p116_p9), %v875_v12  ;;  %v883_v17 = vld [vmem:[%s1261_s1 + $0x120] ss:$8 sps:$4 sm:$0xff] (!%p116_p9)   ;;  %v862_v18 = vld [vmem:[%s1261_s1 + $0x50] ss:$8 sps:$4 sm:$0xff] (!%p116_p9)   ;;  %v887_v19 = vld [vmem:[%s1261_s1 + $0x134] ss:$8 sps:$4 sm:$0xff] (!%p116_p9)  }
  0x14   : > { %448 = vmatprep.subr.bf16.mxu0 (!%p116_p9), %v851_v5  ;;  %v863_v20 = vld [vmem:[%s1261_s1 + $0x64] ss:$8 sps:$4 sm:$0xff] (!%p116_p9)   ;;  %v889_v21 = vld [vmem:[%s1261_s1 + $0x130] ss:$8 sps:$4 sm:$0xff] (!%p116_p9)   ;;  %v865_v22 = vld [vmem:[%s1261_s1 + $0x60] ss:$8 sps:$4 sm:$0xff] (!%p116_p9)  }
  0x15   : > { %s138_s23 = scalar_select %p137_p10, %s1029_s13, 1  ;;  %v893_v23 = vld [vmem:[%s1261_s1 + $0x144] ss:$8 sps:$4 sm:$0xff]   ;;  %v866_v24 = vld [vmem:[%s1261_s1 + $0x74] ss:$8 sps:$4 sm:$0xff]   ;;  %vm990_vm0 = vmmov 0  }
  0x16   : > { %488 = vmatpush1.bf16.msra.mxu1 %v877_v13  ;;  %v895_v25 = vld [vmem:[%s1261_s1 + $0x140] ss:$8 sps:$4 sm:$0xff]   ;;  %v868_v26 = vld [vmem:[%s1261_s1 + $0x70] ss:$8 sps:$4 sm:$0xff]   ;;  %v899_v27 = vld [vmem:[%s1261_s1 + $0x154] ss:$8 sps:$4 sm:$0xff]  }
  0x17   : > { %449 = vmatpush1.bf16.msra.mxu0 %v853_v6  ;;  %489 = vmatprep.subr.bf16.mxu1 %v881_v16  ;;  %s801_s4 = smul.u32 12, %s138_s23  ;;  %v872_v28 = vld [vmem:[%s1261_s1 + $0x84] ss:$8 sps:$4 sm:$0xff]   ;;  %v901_v29 = vld [vmem:[%s1261_s1 + $0x150] ss:$8 sps:$4 sm:$0xff]   ;;  %s991_s28 = smov 64  }
  0x18   : > { %450 = vmatprep.subr.bf16.mxu0 %v854_v7  ;;  %v874_v30 = vld [vmem:[%s1261_s1 + $0x80] ss:$8 sps:$4 sm:$0xff]   ;;  %v905_v31 = vld [vmem:[%s1261_s1 + $0x164] ss:$8 sps:$4 sm:$0xff]   ;;  %v878_v32 = vld [vmem:[%s1261_s1 + $0x94] ss:$8 sps:$4 sm:$0xff]   ;;  %v580_v7 = vlaneseq }
  0x19   : > { %s141_s24 = scalar_lea.vmem %s1260_s0, %s801_s4  ;;  %v907_v35 = vld [vmem:[%s1261_s1 + $0x160] ss:$8 sps:$4 sm:$0xff]   ;;  %v880_v36 = vld [vmem:[%s1261_s1 + $0x90] ss:$8 sps:$4 sm:$0xff]   ;;  %v911_v37 = vld [vmem:[%s1261_s1 + $0x174] ss:$8 sps:$4 sm:$0xff]  }
  0x1a   : > { %490 = vmatpush1.bf16.msra.mxu1 %v883_v17  ;;  %v143_v33 = vld [vmem:[%s141_s24] sm:$0xff]  ;;  %v913_v39 = vld [vmem:[%s1261_s1 + $0x170] ss:$8 sps:$4 sm:$0xff]   ;;  %v890_v41 = vld [vmem:[%s1261_s1 + $0xb4] ss:$8 sps:$4 sm:$0xff]   ;;  %vm533_vm1 = vcmask 523264  }
  0x1b   : > { %451 = vmatpush1.bf16.msra.mxu0 %v856_v8  ;;  %491 = vmatprep.subr.bf16.mxu1 %v887_v19  ;;  %v727_v34 = vcombine.high %v143_v33, %v143_v33  ;;  %v884_v38 = vld [vmem:[%s1261_s1 + $0xa4] ss:$8 sps:$4 sm:$0xff]   ;;  %v886_v40 = vld [vmem:[%s1261_s1 + $0xa0] ss:$8 sps:$4 sm:$0xff]   ;;  %v892_v43 = vld [vmem:[%s1261_s1 + $0xb0] ss:$8 sps:$4 sm:$0xff]   ;;  %v726_v52 = vcombine.low %v143_v33, %v143_v33 }
  0x1c   : > { %452 = vmatprep.subr.bf16.mxu0 %v857_v11  ;;  %v917_v42 = vld [vmem:[%s141_s24 + $0x8] ss:$0 sps:$4 sm:$0xff]   ;;  %v896_v44 = vld [vmem:[%s1261_s1 + $0xc4] ss:$8 sps:$4 sm:$0xff]   ;;  %v902_v46 = vld [vmem:[%s1261_s1 + $0xd4] ss:$8 sps:$4 sm:$0xff]  }
  0x1d   : > { %476 = vmatprep.mubr.bf16.mxu0 %v727_v34  ;;  %v898_v45 = vld [vmem:[%s1261_s1 + $0xc0] ss:$8 sps:$4 sm:$0xff]   ;;  %v904_v47 = vld [vmem:[%s1261_s1 + $0xd0] ss:$8 sps:$4 sm:$0xff]   ;;  %v908_v48 = vld [vmem:[%s1261_s1 + $0xe4] ss:$8 sps:$4 sm:$0xff]  }
  0x1e   : > { %492 = vmatpush1.bf16.msra.mxu1 %v889_v21  ;;  %v910_v49 = vld [vmem:[%s1261_s1 + $0xe0] ss:$8 sps:$4 sm:$0xff]   ;;  %v914_v50 = vld [vmem:[%s1261_s1 + $0xf4] ss:$8 sps:$4 sm:$0xff]   ;;  %v916_v51 = vld [vmem:[%s1261_s1 + $0xf0] ss:$8 sps:$4 sm:$0xff]  }
  0x1f   : > { %453 = vmatpush1.bf16.msra.mxu0 %v859_v14  ;;  %493 = vmatprep.subr.bf16.mxu1 %v893_v23  ;;  %vm600_vm2 = vcmask 1043456   ;;  %v581_v8 = vshrl.u32 %v580_v7, 7  ;;  %v583_v9 = vand.u32 127, %v580_v7  ;;  %vm586_vm4 = vcmask 64512   ;;  %s134_s29 = sand.u32 1, %s978_s10   ;;  %s780_s3 = sshll.u32 %s1029_s13, 7 }
  0x20   : > { %454 = vmatprep.subr.bf16.mxu0 %v860_v15  ;;  %s724_s30 = sshll.u32 %s134_s29, 3  ;;  %s1217_s24 = scalar_lea.hbm %s1262_s2, %s780_s3 }
  0x21   : > { %vm584_vm3 = vcmp.le.s32.totalorder %v583_v9, %v581_v8  ;;  %s136_s5 = scalar_lea.vmem [#allocation2], %s724_s30  ;;  %s648_s13 = scalar_lea.sflag [#allocation3], %s134_s29 }
  0x22   : > { %494 = vmatpush1.bf16.msra.mxu1 %v895_v25  ;;  %s661_s4 = sshll.u32 %s136_s5, 4  ;;  %s992_s14 = smov [#allocation2]   ;;  %s1219_s4 = int_to_ptr.vmem [resolvable:$true] %s661_s4 }
  0x23   : > { %455 = vmatpush1.bf16.msra.mxu0 %v862_v18  ;;  %495 = vmatprep.subr.bf16.mxu1 %v899_v27  ;;  %s924_s8 = scalar_lea.vmem %s1219_s4, 128  ;;  %s928_s16 = sshll.u32 %s992_s14, 4  ;;  %s929_s16 = int_to_ptr.vmem [resolvable:$false] %s928_s16 }
  0x24   : > { %456 = vmatprep.subr.bf16.mxu0 %v863_v20  ;;  %p925_p11 = scmp.ne.s32.totalorder %s1219_s4, %s924_s8  ;;  %s930_s17 = scalar_lea.vmem %s929_s16, 256 }
  0x25   : > { %p931_p0 = scmp.lt.s32.totalorder %s1219_s4, %s929_s16  ;;  %p932_p1 = scmp.lt.s32.totalorder %s930_s17, %s924_s8 }
  0x26   : > { %496 = vmatpush1.bf16.msra.mxu1 %v901_v29  ;;  %p926_p12 = pnand %p925_p11, %p1046_p5 }
  0x27   : > { %457 = vmatpush1.bf16.msra.mxu0 %v865_v22  ;;  %497 = vmatprep.subr.bf16.mxu1 %v905_v31  ;;  %p933_p2 = por %p932_p1, %p931_p0 }
  0x28   : > { %458 = vmatprep.subr.bf16.mxu0 %v866_v24  ;;  %p927_p13 = pneg %p926_p12 }
  0x2a   : > { %498 = vmatpush1.bf16.msra.mxu1 %v907_v35  ;;  %p934_p3 = pnand %p933_p2, %p927_p13 }
  0x2b   : > { %459 = vmatpush1.bf16.msra.mxu0 %v868_v26  ;;  %499 = vmatprep.subr.bf16.mxu1 %v911_v37 }
  0x2c   : > { %460 = vmatprep.subr.bf16.mxu0 %v872_v28 }
  0x2e   : > { %500 = vmatpush1.bf16.msra.mxu1 %v913_v39 }
  0x2f   : > { %461 = vmatpush1.bf16.msra.mxu0 %v874_v30  ;;  %787 = vmatprep.subr.bf16.mxu1 %v989_v57 }
  0x30   : > { %462 = vmatprep.subr.bf16.mxu0 %v878_v32 }
  0x31   : > { %518 = vmatmul.mubr.bf16.vlgmr.msra.gmra.mrb[0].mxu1 %v917_v42 }
  0x32   : > { %789 = vmatprep.mubr.msk.bf16.mxu1 %vm990_vm0, %v989_v57 }
  0x33   : > { %463 = vmatpush1.bf16.msra.mxu0 %v880_v36 }
  0x34   : > { %464 = vmatprep.subr.bf16.mxu0 %v884_v38 }
  0x37   : > { %465 = vmatpush1.bf16.msra.mxu0 %v886_v40 }
  0x38   : > { %466 = vmatprep.subr.bf16.mxu0 %v890_v41 }
  0x3b   : > { %467 = vmatpush1.bf16.msra.mxu0 %v892_v43 }
  0x3c   : > { %468 = vmatprep.subr.bf16.mxu0 %v896_v44 }
  0x3f   : > { %469 = vmatpush1.bf16.msra.mxu0 %v898_v45 }
  0x40   : > { %470 = vmatprep.subr.bf16.mxu0 %v902_v46 }
  0x43   : > { %471 = vmatpush1.bf16.msra.mxu0 %v904_v47 }
  0x44   : > { %472 = vmatprep.subr.bf16.mxu0 %v908_v48 }
  0x47   : > { %473 = vmatpush1.bf16.msra.mxu0 %v910_v49 }
  0x48   : > { %474 = vmatprep.subr.bf16.mxu0 %v914_v50 }
  0x4b   : > { %475 = vmatpush1.bf16.msra.mxu0 %v916_v51 }
  0x4e   : > { %477 = vmatmul.mubr.bf16.vlgmr.msra.gmra.mrb[0].mxu0 %v726_v52 }
 0x104   : > { %v519_v53 = vpop.f32.mrb[0].mxu1 }
 0x105   : > { %v521_v54 = vpop.f32.mrb[1].mxu1 }
 0x106   : > { %v523_v55 = vpop.f32.mrb[2].mxu1 }
 0x107   : > { %v524_v56 = vpop.f32.mrb[3].mxu1 }
 0x121   : > { %v478_v58 = vpop.f32.mrb[0].mxu0 }
 0x122   : > { %v520_v59 = vadd.f32 %v519_v53, %v478_v58  ;;  %v480_v60 = vpop.f32.mrb[1].mxu0 }
 0x123   : > { %v522_v61 = vadd.f32 %v521_v54, %v480_v60  ;;  %v482_v62 = vpop.f32.mrb[2].mxu0 }
 0x124   : > { %v483_v63 = vpop.f32.mrb[3].mxu0  ;;  %v528_v0 = vpack.c.bf16 %v520_v59, %v520_v59  ;;  %v526_v3 = vmul.f32 0.05103104, %v520_v59 }
 0x125   : > { %v529_v4 = vpack.c.bf16 %v522_v61, %v522_v61 }
 0x126   : > { %531 = vrot.lane.b32.xlu0 %v528_v0, %s991_s28  ;;  %v527_v5 = vpack.c.bf16 %v526_v3, %v526_v3 }
 0x127   : > { %v602_v6 = vsel %vm600_vm2, %v529_v4, 0 }
 0x198   : > { %v532_v1 = vpop.permute.xlu0 %531 }
 0x199   : > { %v538_v2 = vsel %vm533_vm1, %v532_v1, 0 }
 0x19a   : > { %788 = vmatpush3.bf16.xpose.msra.mxu1 %v538_v2 }
 0x19b   : > { %793 = vmatprep.subr.bf16.mxu1 %v989_v57 }
 0x1a1   : > { %790 = vmatmul.mubr.msk.bf16.vlgmr.msra.gmra.mrb[4].mxu1 %vm533_vm1, %v527_v5 }
 0x1a2   : > { %794 = vmatpush3.bf16.msra.mxu1 %v602_v6  ;;  %795 = vmatprep.mubr.msk.bf16.mxu1 %vm990_vm0, %v989_v57 }
 0x274   : > { %v574_v10 = vpop.f32.mrb[4].mxu1 }
 0x275   : > { %v585_v11 = vsel %vm584_vm3, %v574_v10, -1e+30  ;;  %v791_v12 = vpop.f32.mrb[5].mxu1 }
 0x276   : > { %v577_v13 = vpop.f32.mrb[6].mxu1  ;;  %v587_v14 = vsel %vm586_vm4, %v585_v11, -inf }
 0x277   : > { %588 = vmax.xlane.f32.xlu0 %v587_v14  ;;  %v792_v15 = vpop.f32.mrb[7].mxu1 }
 0x304   : > { %v589_v16 = vpop.xlane.xlu0 %588 }
 0x305   : > { %v590_v17 = vsub.f32 %v585_v11, %v589_v16 }
 0x307   : > { %v591_v18 = vmul.f32 1.442695, %v590_v17 }
 0x309   : > { %920 = vpow2.f32 %v591_v18 }
 0x313   : > { %v921_v19 = vpop.eup %920 }
 0x314   : > { %v593_v20 = vsel %vm586_vm4, %v921_v19, 0.0  ;;  %v596_v21 = vpack.c.bf16 %v921_v19, %v921_v19 }
 0x315   : > { %594 = vadd.xlane.f32.xlu1 %v593_v20 }
 0x316   : > { %796 = vmatmul.mubr.msk.bf16.vlgmr.msra.gmra.mrb[8].mxu1 %vm586_vm4, %v596_v21 }
 0x3a2   : > { %v595_v22 = vpop.xlane.xlu1 %594 }
 0x3a3   : > { %922 = vrcp.f32 %v595_v22 }
 0x3ad   : > { %v923_v23 = vpop.eup %922 }
 0x3e9   : > { %v638_v24 = vpop.f32.mrb[8].mxu1 }
 0x3ea   : > { %v645_v25 = vmul.f32 %v923_v23, %v638_v24  ;;  %v797_v26 = vpop.f32.mrb[9].mxu1 }
 0x3eb   : > { %v641_v27 = vpop.f32.mrb[10].mxu1 }
 0x3ec   : > { %v798_v28 = vpop.f32.mrb[11].mxu1  ;;  %646 = vst.msk [vmem:[%s136_s5] sm:$0xff] %vm533_vm1, %v645_v25 }
 0x3ed   : > { %937 = shalt.err (!%p934_p3)
}
 0x3ee   : > { %s938_s21 = scalar_lea.hbm %s1217_s24, 128  ;;  %s942_s25 = scalar_lea.hbm %s1262_s2, 256 }
 0x3ef   : > { %p939_p4 = scmp.ne.s32.totalorder %s1217_s24, %s938_s21  ;;  %p943_p9 = scmp.lt.u32.totalorder %s1217_s24, %s1262_s2 }
 0x3f0   : > { %p944_p10 = scmp.lt.u32.totalorder %s942_s25, %s938_s21  ;;  %p946_p12 = scmp.lt.u32.totalorder %s938_s21, %s1217_s24 }
 0x3f1   : > { %p940_p7 = pnand %p939_p4, %p1046_p5 }
 0x3f2   : > { %p945_p11 = por %p944_p10, %p943_p9 }
 0x3f3   : > { %p941_p8 = pneg %p940_p7 }
 0x3f4   : > { %p947_p13 = por %p946_p12, %p945_p11 }
 0x3f6   : > { %p948_p0 = pnand %p947_p13, %p941_p8 }
 0x3f8   : > { %951 = shalt.err (!%p948_p0)
}
 0x3f9   : > { %802 = dma.vmem_to_hbm [thread:$0]  (%p1046_p5), %s1219_s4, 128, %s1217_s24, %s648_s13  }
 0x3fa PF: > { %p808_p1 = scmp.ge.s32.totalorder %s986_s12, 2  ;;  %s673_s28 = sand.u32 1, %s974_s9  }
 0x3fb   : > { %s674_s29 = scalar_lea.sflag [#allocation3], %s673_s28 }
 0x3fc   : > { %p805_p2 = pnand %p808_p1, %p1050_p6 }
 0x3fe   : > { %969 = dma.done.wait (!%p805_p2), %s674_s29, 128  }
 0x3ff   : > { %971 = vsyncadd (!%p805_p2), %s674_s29, 4294967168  ;;  %p12_p3 = scmp.ge.s32.totalorder %s1033_s15, 4   ;;  %s1265_s9 = smov %s978_s10 }
 0x400   : > { %s1266_s10 = smov %s982_s11  ;;  %s1267_s11 = smov %s1044_s18 }
 0x401   : > { %s1268_s12 = smov %s1033_s15  ;;  %14 = sbr.rel (!%p12_p3) target bundleno = 3 (0x3), region = 63 }
 0x408   :  { %679 = vsyncpa [#allocation3], 1 }
 0x409   :  { %681 = vsyncpa [#allocation3 + $0x1], 1 }

</bundles_post_ra>
